<compile_context>
chip_gen: v7x
topology: tpu7x:2x2x1
jax: 0.10.0
libtpu: 0.0.40
codegen_flags: <defaults>
</compile_context>

<pallas_src>
import functools

import jax
import jax.numpy as jnp
from jax.experimental import pallas as pl
from jax.experimental.pallas import tpu as pltpu


def _emd_partial_kernel(x_ref, y_ref, out_ref, *, n_total, tm):
    """Per-grid-block partial sum of per-row EMD values.

    emd_r = sum_j |y_r - j| * softmax(x_r)_j
          = (sum_j exp(x_rj - m_r) * |y_r - j|) / (sum_j exp(x_rj - m_r))
    """
    i = pl.program_id(0)
    x = x_ref[...].astype(jnp.float32)               # (tm, C), cast from native dtype
    y = y_ref[...]                                    # (tm, 1) int32
    c = x.shape[-1]

    # Numerically stable exp (denominator-deferred softmax).
    m = jnp.max(x, axis=-1, keepdims=True)
    e = jnp.exp(x - m)                                # (tm, C)

    # |y - j| directly from an iota — replaces distances[y] gather / matmul.
    col = jax.lax.broadcasted_iota(jnp.int32, (tm, c), 1)
    dist = jnp.abs(col - y).astype(jnp.float32)       # (tm, C)

    num = jnp.sum(e * dist, axis=-1, keepdims=True)   # (tm, 1)
    den = jnp.sum(e, axis=-1, keepdims=True)          # (tm, 1)
    emd_rows = num / den                              # exact division (tolerance-safe)

    # Mask rows past the true N (padded tail tile); also kills any garbage
    # from the out-of-bounds padded region.
    row = jax.lax.broadcasted_iota(jnp.int32, (tm, 1), 0) + i * tm
    emd_rows = jnp.where(row < n_total, emd_rows, 0.0)

    partial = jnp.sum(emd_rows)

    # Lane-dense (1, 128) output row; the partial sum lives in lane 0.
    lane = jax.lax.broadcasted_iota(jnp.int32, (1, 128), 1)
    out_ref[...] = jnp.where(lane == 0, partial, jnp.float32(0.0))


def emd_pallas(x, y, *, tm=None):
    """x: (N, C) float (any dtype), y: (N,) int -> scalar mean EMD (float32)."""
    n, c = x.shape
    y2 = y.reshape(n, 1).astype(jnp.int32)
    itemsize = jnp.dtype(x.dtype).itemsize

    if tm is None:
        # Largest multiple of 8 such that one x tile <= ~8 MiB (so the
        # double-buffered pair stays under every generation's scoped-VMEM
        # default, including v7x's 32 MiB default / 64 MiB physical).
        budget_bytes = 8 * 1024 * 1024
        tm = (budget_bytes // max(1, c * itemsize)) // 8 * 8
        tm = max(8, min(tm, 2048))
    n_pad8 = ((n + 7) // 8) * 8
    tm = min(tm, n_pad8)
    num_blocks = pl.cdiv(n, tm)

    kernel = functools.partial(_emd_partial_kernel, n_total=n, tm=tm)
    cost = pl.CostEstimate(
        flops=5 * n * c,
        transcendentals=n * c,
        bytes_accessed=n * c * itemsize + n * 4 + num_blocks * 128 * 4,
    )

    partials = pl.pallas_call(
        kernel,
        out_shape=jax.ShapeDtypeStruct((num_blocks, 128), jnp.float32),
        grid=(num_blocks,),
        in_specs=[
            pl.BlockSpec((tm, c), lambda i: (i, 0)),   # x tile (native dtype)
            pl.BlockSpec((tm, 1), lambda i: (i, 0)),   # y tile
        ],
        out_specs=pl.BlockSpec((1, 128), lambda i: (i, 0)),
        compiler_params=pltpu.CompilerParams(
            dimension_semantics=("parallel",)),
        cost_estimate=cost,
    )(x, y2)

    return jnp.sum(partials) / jnp.float32(n)


@functools.partial(jax.jit, static_argnames=("ntil_lambda", "has_mle"))
def emd_forward(x, y, mle_loss_value=None, *, ntil_lambda=0.3, has_mle=True):
    """Equivalent of EMD.forward (tokenizer=None path)."""
    if ntil_lambda == 0.0:
        return mle_loss_value
    emd = emd_pallas(x, y)
    if has_mle and mle_loss_value is not None:
        mle = mle_loss_value
        norm_emd = jax.lax.stop_gradient(mle / (emd + 1e-10)) * ntil_lambda * emd
        return norm_emd + mle
    return emd


# TODO(synk): the tokenizer-driven path (compute_emd_with_tokenizer) with its
# Python-level digit-token matching / positional exponent weights is host-side
# data-dependent control flow and is not translated here.


def _reference_emd(x, y):
    """Pure-JAX reference of compute_emd_directly."""
    xf = x.astype(jnp.float32)
    p = jax.nn.softmax(xf, axis=-1)
    c = x.shape[1]
    dist = jnp.abs(y[:, None].astype(jnp.float32)
                   - jnp.arange(c, dtype=jnp.float32)[None, :])
    return jnp.mean(jnp.sum(dist * p, axis=-1))


if __name__ == "__main__":
    key = jax.random.PRNGKey(0)
    kx, ky, km, kx2, ky2 = jax.random.split(key, 5)

    # Case 1: digit-like setup — 8 samples, 10 classes, f32, with MLE mixing.
    N, C = 8, 10
    x = jax.random.normal(kx, (N, C), dtype=jnp.float32)
    y = jax.random.randint(ky, (N,), 0, C, dtype=jnp.int32)
    mle = jnp.abs(jax.random.normal(km, (), dtype=jnp.float32)) + 0.5

    out = jax.block_until_ready(emd_forward(x, y, mle, ntil_lambda=0.3, has_mle=True))
    emd_ref = _reference_emd(x, y)
    ref_out = jax.lax.stop_gradient(mle / (emd_ref + 1e-10)) * 0.3 * emd_ref + mle
    assert jnp.allclose(out, ref_out, rtol=1e-5, atol=1e-5), (out, ref_out)

    # "no MLE" branch returns the raw EMD scalar.
    emd_only = jax.block_until_ready(
        emd_forward(x, y, None, ntil_lambda=0.3, has_mle=False))
    assert jnp.allclose(emd_only, emd_ref, rtol=1e-5, atol=1e-5), (emd_only, emd_ref)

    # Case 2: bf16 logits, N not a multiple of the tile, multi-block grid —
    # exercises native-dtype streaming, tail-row masking and the parallel
    # partial-sum reduction.
    N2, C2 = 20, 37
    x2 = jax.random.normal(kx2, (N2, C2), dtype=jnp.bfloat16)
    y2 = jax.random.randint(ky2, (N2,), 0, C2, dtype=jnp.int32)
    emd2 = jax.block_until_ready(emd_pallas(x2, y2, tm=8))   # 3 blocks, 4 masked rows
    emd2_ref = _reference_emd(x2, y2)
    assert jnp.allclose(emd2, emd2_ref, rtol=1e-4, atol=1e-4), (emd2, emd2_ref)

    print("KERNEL_OK")
</pallas_src>

<mosaic_0001>
module attributes {stable_mosaic.version = 11 : i64} {
  func.func @_emd_partial_kernel(%arg0: i32, %arg1: memref<8x10xf32, #tpu.memory_space<vmem>>, %arg2: memref<8x1xi32, #tpu.memory_space<vmem>>, %arg3: memref<1x128xf32, #tpu.memory_space<vmem>>) attributes {dimension_semantics = [#tpu.dimension_semantics<parallel>], iteration_bounds = array<i64: 1>, scalar_prefetch = 0 : i64, scratch_operands = 0 : i64, tpu.core_type = #tpu.core_type<tc>, window_params = [{transform_indices = @transform_0, window_bounds = array<i64: 8, 10>}, {transform_indices = @transform_1, window_bounds = array<i64: 8, 1>}, {transform_indices = @transform_2, window_bounds = array<i64: 1, 128>}]} {
    %c0 = arith.constant 0 : index
    %c0_0 = arith.constant 0 : index
    %0 = vector.load %arg1[%c0, %c0_0] : memref<8x10xf32, #tpu.memory_space<vmem>>, vector<8x10xf32>
    %c0_1 = arith.constant 0 : index
    %c0_2 = arith.constant 0 : index
    %1 = vector.load %arg2[%c0_1, %c0_2] : memref<8x1xi32, #tpu.memory_space<vmem>>, vector<8x1xi32>
    %cst = arith.constant dense<0xFF800000> : vector<8xf32>
    %2 = vector.multi_reduction <maximumf>, %0, %cst [1] : vector<8x10xf32> to vector<8xf32>
    %3 = vector.shape_cast %2 : vector<8xf32> to vector<8x1xf32>
    %4 = vector.broadcast %3 : vector<8x1xf32> to vector<8x10xf32>
    %5 = arith.subf %0, %4 : vector<8x10xf32>
    %6 = math.exp %5 : vector<8x10xf32>
    %7 = tpu.iota {dimensions = array<i32: 1>} : vector<8x10xi32>
    %8 = vector.broadcast %1 : vector<8x1xi32> to vector<8x10xi32>
    %9 = arith.subi %7, %8 : vector<8x10xi32>
    %10 = math.absi %9 : vector<8x10xi32>
    %11 = arith.sitofp %10 : vector<8x10xi32> to vector<8x10xf32>
    %12 = arith.mulf %6, %11 : vector<8x10xf32>
    %cst_3 = arith.constant dense<0.000000e+00> : vector<8xf32>
    %13 = vector.multi_reduction <add>, %12, %cst_3 [1] : vector<8x10xf32> to vector<8xf32>
    %14 = vector.shape_cast %13 : vector<8xf32> to vector<8x1xf32>
    %cst_4 = arith.constant dense<0.000000e+00> : vector<8xf32>
    %15 = vector.multi_reduction <add>, %6, %cst_4 [1] : vector<8x10xf32> to vector<8xf32>
    %16 = vector.shape_cast %15 : vector<8xf32> to vector<8x1xf32>
    %17 = arith.divf %14, %16 : vector<8x1xf32>
    %18 = tpu.iota {dimensions = array<i32: 0>} : vector<8x1xi32>
    %c8_i32 = arith.constant 8 : i32
    %19 = arith.muli %arg0, %c8_i32 : i32
    %20 = vector.broadcast %19 : i32 to vector<8x1xi32>
    %21 = arith.addi %18, %20 : vector<8x1xi32>
    %c8_i32_5 = arith.constant 8 : i32
    %22 = vector.broadcast %c8_i32_5 : i32 to vector<8x1xi32>
    %23 = arith.cmpi slt, %21, %22 : vector<8x1xi32>
    %cst_6 = arith.constant 0.000000e+00 : f32
    %24 = vector.broadcast %cst_6 : f32 to vector<8x1xf32>
    %25 = arith.select %23, %17, %24 : vector<8x1xi1>, vector<8x1xf32>
    %26 = vector.shape_cast %25 : vector<8x1xf32> to vector<1x8x1xf32>
    %cst_7 = arith.constant dense<0.000000e+00> : vector<1xf32>
    %27 = vector.multi_reduction <add>, %26, %cst_7 [1, 2] : vector<1x8x1xf32> to vector<1xf32>
    %28 = vector.shape_cast %27 : vector<1xf32> to vector<1x1x1xf32>
    %29 = vector.extract %28[0, 0, 0] : f32 from vector<1x1x1xf32>
    %30 = tpu.iota {dimensions = array<i32: 1>} : vector<1x128xi32>
    %c0_i32 = arith.constant 0 : i32
    %31 = vector.broadcast %c0_i32 : i32 to vector<1x128xi32>
    %32 = arith.cmpi eq, %30, %31 : vector<1x128xi32>
    %cst_8 = arith.constant 0.000000e+00 : f32
    %33 = vector.broadcast %29 : f32 to vector<1x128xf32>
    %34 = vector.broadcast %cst_8 : f32 to vector<1x128xf32>
    %35 = arith.select %32, %33, %34 : vector<1x128xi1>, vector<1x128xf32>
    %c0_9 = arith.constant 0 : index
    %c0_10 = arith.constant 0 : index
    %36 = vector.load %arg3[%c0_9, %c0_10] : memref<1x128xf32, #tpu.memory_space<vmem>>, vector<1x128xf32>
    tpu.vector_store %arg3[%c0_9, %c0_10], %35 {strides = array<i32>} : memref<1x128xf32, #tpu.memory_space<vmem>>, vector<1x128xf32>,
    return
  }
  func.func @transform_0(%arg0: i32) -> (i32, i32) {
    %c0_i32 = arith.constant 0 : i32
    %c0_i32_0 = arith.constant 0 : i32
    return %arg0, %c0_i32 : i32, i32
  }
  func.func @transform_1(%arg0: i32) -> (i32, i32) {
    %c0_i32 = arith.constant 0 : i32
    %c0_i32_0 = arith.constant 0 : i32
    return %arg0, %c0_i32 : i32, i32
  }
  func.func @transform_2(%arg0: i32) -> (i32, i32) {
    %c0_i32 = arith.constant 0 : i32
    %c0_i32_0 = arith.constant 0 : i32
    return %arg0, %c0_i32 : i32, i32
  }
}

</mosaic_0001>

<bundles_post_ra>
// kernel: emd_forward.1
= control target key start
LH: loop header
LB: loop body
LE: loop exit
PB: predicated region body
PF: predicated region fallthrough
CT: control target
= control target key end

     0   :  { %vm13_vm0 = vcmask 80896   ;;  %v74_v1 = vmov 0   ;;  %v20_v6 = vlaneseq  ;;  %vm46_vm1 = vcmask 7168   ;;  %s102_s0 = inlined_call_operand.vmem [shape: f32[8,10], index: 0, kind: input, shape index: {}]   ;;  %s103_s1 = inlined_call_operand.vmem [shape: s32[8,1], index: 1, kind: input, shape index: {}]   ;;  %s104_s2 = inlined_call_operand.vmem [shape: f32[1,128], index: 2, kind: output, shape index: {}]  }
   0x1   :  { %v11_v0 = vld [vmem:[%s102_s0] sm:$0xff]  ;;  %69 = vset.pattern.permute.xlu0 %v74_v1 }
   0x2   :  { %v14_v2 = vsel %vm13_vm0, %v11_v0, -inf  ;;  %v12_v3 = vld [vmem:[%s103_s1] sm:$0xff]  ;;  %v21_v8 = vand.u32 127, %v20_v6 }
   0x3   :  { %15 = vmax.xlane.f32.xlu0 %v14_v2 }
   0x4   :  { %vm57_vm2 = vcmp.eq.s32.totalorder %v21_v8, 0 }
  0x19   :  { %23 = vperm.xlu0 %69, %v12_v3  }
  0x90   :  { %v16_v4 = vpop.xlane.xlu0 %15 }
  0x91   :  { %v17_v5 = vsub.f32 %v11_v0, %v16_v4 }
  0x93   :  { %v18_v7 = vmul.f32 1.442695, %v17_v5 }
  0x95   :  { %70 = vpow2.f32 %v18_v7 }
  0x98   :  { %v24_v9 = vpop.permute.xlu0 %23 }
  0x99   :  { %v25_v10 = vsub.s32 %v21_v8, %v24_v9 }
  0x9b   :  { %v27_v11 = vsub.s32 0, %v25_v10 }
  0x9d   :  { %v65_v12 = vmin.u32 %v27_v11, %v25_v10 }
  0x9f   :  { %v71_v13 = vpop.eup %70  ;;  %v29_v14 = vcvt.s32.f32 %v65_v12 }
  0xa0   :  { %v34_v15 = vsel %vm13_vm0, %v71_v13, 0.0 }
  0xa1   :  { %35 = vadd.xlane.f32.xlu1 %v34_v15  ;;  %v30_v16 = vmul.f32 %v71_v13, %v29_v14 }
  0xa3   :  { %v31_v17 = vsel %vm13_vm0, %v30_v16, 0.0 }
  0xa5   :  { %32 = vadd.xlane.f32.xlu1 %v31_v17 }
 0x12e   :  { %v36_v18 = vpop.xlane.xlu1 %35 }
 0x12f   :  { %72 = vrcp.f32 %v36_v18 }
 0x132   :  { %v33_v20 = vpop.xlane.xlu1 %32 }
 0x139   :  { %v73_v19 = vpop.eup %72 }
 0x13a   :  { %v38_v21 = vmul.f32 %v73_v19, %v33_v20 }
 0x13c   :  { %v47_v22 = vsel %vm46_vm1, %v38_v21, 0.0 }
 0x13d   :  { %48 = vadd.xlane.f32.xlu1 %v47_v22 }
 0x1ca   :  { %v49_v23 = vpop.xlane.xlu1 %48 }
 0x1cb   :  { %v50_v24 = vrot.slane %v49_v23, 4 }
 0x1cd   :  { %v51_v25 = vadd.f32 %v50_v24, %v49_v23 }
 0x1cf   :  { %v52_v26 = vrot.slane %v51_v25, 2 }
 0x1d1   :  { %v53_v27 = vadd.f32 %v52_v26, %v51_v25 }
 0x1d3   :  { %v54_v28 = vrot.slane %v53_v27, 1 }
 0x1d5   :  { %v55_v29 = vadd.f32 %v54_v28, %v53_v27 }
 0x1d7   :  { %66 = vpush %v55_v29 }
 0x208   :  { %s67_s0 = spop %66 }
 0x209   :  { %v58_v30 = vstv %s67_s0 }
 0x20a   :  { %v59_v31 = vsel %vm57_vm2, %v58_v30, 0.0 }
 0x20b   :  { %60 = vst [vmem:[%s104_s2] sm:$0x1] %v59_v31 }

</bundles_post_ra>
